<compile_context>
chip_gen: v5e
topology: v5e:2x2
jax: 0.10.0
libtpu: 0.0.40
codegen_flags: <defaults>
</compile_context>

<pallas_src>
import jax
import jax.numpy as jnp
from jax.experimental import pallas as pl
from jax.experimental.pallas import tpu as pltpu

HIDDEN = 50        # logical hidden width (matches nn.Linear(_s_dim, 50))
HID_PAD = 128      # lane-aligned padded hidden width
TILE_B_MAX = 2048  # batch rows per grid step (multiple of 8)


def _round_up(x, m):
    return ((x + m - 1) // m) * m


def _choose_tile_b(batch):
    if batch <= 256:
        return _round_up(batch, 8)
    # Split into at least two tiles so v7x's two TensorCores both get work;
    # cap the per-step tile so the grid stays a cheap streaming loop.
    return min(_round_up(-(-batch // 2), 8), TILE_B_MAX)


def cnet_kernel(s_ref, a_ref, ws_ref, p_ref, out_ref):
    # p_ref rows: 0 = fca weight row, 1 = fcs_b + fca_b (combined hidden bias),
    #             2 = out weight row, 3 = [out bias, 0, ...]
    # hidden = s @ Ws  +  a * wa_row  +  bias      (a-branch on the VPU)
    h = jnp.dot(s_ref[...], ws_ref[...], preferred_element_type=jnp.float32)
    h = h + a_ref[...] * p_ref[0:1, :] + p_ref[1:2, :]
    net = jnp.maximum(h, 0.0)                                   # (tile_b, 128)
    # Output projection: VPU mul + XLU lane reduce -> (tile_b, 1).
    # No transpose of `net`; padded lanes (50..127) are zero in both factors.
    q = jnp.sum(net * p_ref[2:3, :], axis=-1, keepdims=True)
    out_ref[...] = (q + p_ref[3:4, 0:1]).astype(out_ref.dtype)


def prepare_params(params, s_dim):
    """One-time conversion of PyTorch-layout params into kernel-ready arrays.

    Call ONCE after loading / updating weights, not per forward."""
    ws = jnp.zeros((s_dim, HID_PAD), jnp.float32).at[:, :HIDDEN].set(
        params["fcs_w"].T.astype(jnp.float32))                  # (s_dim, 128)
    p = jnp.zeros((4, HID_PAD), jnp.float32)
    p = p.at[0, :HIDDEN].set(params["fca_w"].reshape(HIDDEN))   # fca weight row
    p = p.at[1, :HIDDEN].set(params["fcs_b"] + params["fca_b"]) # combined bias
    p = p.at[2, :HIDDEN].set(params["out_w"].reshape(HIDDEN))   # out weight row
    p = p.at[3, 0].set(params["out_b"].reshape(()))             # out bias
    return {"ws": ws, "p": p}


def cnet_forward(s, a, prep):
    """s: (B, s_dim) f32, a: (B, 1) f32, prep: prepare_params output -> (B, 1)."""
    B, s_dim = s.shape
    tile_b = _choose_tile_b(B)
    num_tiles = pl.cdiv(B, tile_b)

    # Scoped-VMEM estimate: double-buffered s/a/out tiles + resident params
    # + the h/net intermediates.  Only override the compiler default when a
    # big s_dim * tile_b combination would exceed v5e's 16 MiB default region.
    vmem_est = 4 * (2 * tile_b * (s_dim + 2)
                    + (s_dim + 4) * HID_PAD
                    + 2 * tile_b * HID_PAD)
    vmem_limit = int(1.5 * vmem_est) if vmem_est > (12 << 20) else None

    grid_spec = pltpu.PrefetchScalarGridSpec(
        num_scalar_prefetch=0,
        grid=(num_tiles,),
        in_specs=[
            pl.BlockSpec((tile_b, s_dim), lambda i: (i, 0)),    # s tile (streamed)
            pl.BlockSpec((tile_b, 1), lambda i: (i, 0)),        # a tile (streamed)
            pl.BlockSpec((s_dim, HID_PAD), lambda i: (0, 0)),   # Ws (resident)
            pl.BlockSpec((4, HID_PAD), lambda i: (0, 0)),       # stacked small params
        ],
        out_specs=pl.BlockSpec((tile_b, 1), lambda i: (i, 0)),  # q column
    )

    return pl.pallas_call(
        cnet_kernel,
        out_shape=jax.ShapeDtypeStruct((B, 1), jnp.float32),
        grid_spec=grid_spec,
        compiler_params=pltpu.CompilerParams(
            dimension_semantics=("parallel",),
            vmem_limit_bytes=vmem_limit),
    )(s, a, prep["ws"], prep["p"])


def init_params(key, s_dim):
    """Deterministic synthetic init mirroring CNet.__init__ shapes.
    Weights ~ N(0, 0.01); biases use PyTorch Linear's default uniform."""
    k = jax.random.split(key, 6)

    def u(kk, shape, fan_in):
        bound = 1.0 / jnp.sqrt(jnp.float32(fan_in))
        return jax.random.uniform(kk, shape, jnp.float32, -bound, bound)

    return {
        "fcs_w": 0.01 * jax.random.normal(k[0], (HIDDEN, s_dim), jnp.float32),
        "fcs_b": u(k[1], (HIDDEN,), s_dim),
        "fca_w": 0.01 * jax.random.normal(k[2], (HIDDEN, 1), jnp.float32),
        "fca_b": u(k[3], (HIDDEN,), 1),
        "out_w": 0.01 * jax.random.normal(k[4], (1, HIDDEN), jnp.float32),
        "out_b": u(k[5], (1,), HIDDEN),
    }


def cnet_ref(s, a, p):
    x = s @ p["fcs_w"].T + p["fcs_b"]
    y = a @ p["fca_w"].T + p["fca_b"]
    net = jnp.maximum(x + y, 0.0)
    return net @ p["out_w"].T + p["out_b"]


if __name__ == "__main__":
    S_DIM = 16
    key = jax.random.PRNGKey(0)
    kp, ks, ka = jax.random.split(key, 3)

    params = init_params(kp, S_DIM)
    prep = prepare_params(params, S_DIM)   # one-time, hoisted out of the call path

    # Even batch (full tiles).
    B = 8
    s = jax.random.normal(ks, (B, S_DIM), jnp.float32)
    a = jax.random.normal(ka, (B, 1), jnp.float32)
    q = jax.block_until_ready(cnet_forward(s, a, prep))
    q_ref = cnet_ref(s, a, params)
    assert q.shape == (B, 1)
    assert jnp.allclose(q, q_ref, atol=1e-5, rtol=1e-5)

    # Ragged batch (exercises the no-pad partial last block path).
    B2 = 19
    s2 = jax.random.normal(ks, (B2, S_DIM), jnp.float32)
    a2 = jax.random.normal(ka, (B2, 1), jnp.float32)
    q2 = jax.block_until_ready(cnet_forward(s2, a2, prep))
    q2_ref = cnet_ref(s2, a2, params)
    assert q2.shape == (B2, 1)
    assert jnp.allclose(q2, q2_ref, atol=1e-5, rtol=1e-5)

    print("KERNEL_OK")
</pallas_src>

<mosaic_0001>
module attributes {stable_mosaic.version = 11 : i64} {
  func.func @cnet_kernel(%arg0: i32, %arg1: memref<8x16xf32, #tpu.memory_space<vmem>>, %arg2: memref<8x1xf32, #tpu.memory_space<vmem>>, %arg3: memref<16x128xf32, #tpu.memory_space<vmem>>, %arg4: memref<4x128xf32, #tpu.memory_space<vmem>>, %arg5: memref<8x1xf32, #tpu.memory_space<vmem>>) attributes {dimension_semantics = [#tpu.dimension_semantics<parallel>], iteration_bounds = array<i64: 1>, scalar_prefetch = 0 : i64, scratch_operands = 0 : i64, tpu.core_type = #tpu.core_type<tc>, window_params = [{transform_indices = @transform_0, window_bounds = array<i64: 8, 16>}, {transform_indices = @transform_1, window_bounds = array<i64: 8, 1>}, {pipeline_mode = #tpu.pipeline_mode<synchronous>, transform_indices = @transform_2, window_bounds = array<i64: 16, 128>}, {pipeline_mode = #tpu.pipeline_mode<synchronous>, transform_indices = @transform_3, window_bounds = array<i64: 4, 128>}, {transform_indices = @transform_4, window_bounds = array<i64: 8, 1>}]} {
    %c0 = arith.constant 0 : index
    %c0_0 = arith.constant 0 : index
    %0 = vector.load %arg1[%c0, %c0_0] : memref<8x16xf32, #tpu.memory_space<vmem>>, vector<8x16xf32>
    %c0_1 = arith.constant 0 : index
    %c0_2 = arith.constant 0 : index
    %1 = vector.load %arg3[%c0_1, %c0_2] : memref<16x128xf32, #tpu.memory_space<vmem>>, vector<16x128xf32>
    %cst = arith.constant dense<0.000000e+00> : vector<8x128xf32>
    %2 = tpu.matmul %0, %1, %cst {dimension_numbers = #tpu.dot_dimension_numbers<[1], [0], [0], [1], [0, 0, 1, 1], [], []>} : vector<8x16xf32>, vector<16x128xf32>, vector<8x128xf32> -> vector<8x128xf32>
    %c0_3 = arith.constant 0 : index
    %c0_4 = arith.constant 0 : index
    %3 = vector.load %arg2[%c0_3, %c0_4] : memref<8x1xf32, #tpu.memory_space<vmem>>, vector<8x1xf32>
    %c0_5 = arith.constant 0 : index
    %c0_6 = arith.constant 0 : index
    %4 = vector.load %arg4[%c0_5, %c0_6] : memref<4x128xf32, #tpu.memory_space<vmem>>, vector<1x128xf32>
    %5 = vector.broadcast %3 : vector<8x1xf32> to vector<8x128xf32>
    %6 = vector.broadcast %4 : vector<1x128xf32> to vector<8x128xf32>
    %7 = arith.mulf %5, %6 : vector<8x128xf32>
    %8 = arith.addf %2, %7 : vector<8x128xf32>
    %c1 = arith.constant 1 : index
    %c0_7 = arith.constant 0 : index
    %9 = vector.load %arg4[%c1, %c0_7] : memref<4x128xf32, #tpu.memory_space<vmem>>, vector<1x128xf32>
    %10 = vector.broadcast %9 : vector<1x128xf32> to vector<8x128xf32>
    %11 = arith.addf %8, %10 : vector<8x128xf32>
    %cst_8 = arith.constant 0.000000e+00 : f32
    %12 = vector.broadcast %cst_8 : f32 to vector<8x128xf32>
    %13 = arith.maximumf %11, %12 : vector<8x128xf32>
    %c2 = arith.constant 2 : index
    %c0_9 = arith.constant 0 : index
    %14 = vector.load %arg4[%c2, %c0_9] : memref<4x128xf32, #tpu.memory_space<vmem>>, vector<1x128xf32>
    %15 = vector.broadcast %14 : vector<1x128xf32> to vector<8x128xf32>
    %16 = arith.mulf %13, %15 : vector<8x128xf32>
    %cst_10 = arith.constant dense<0.000000e+00> : vector<8xf32>
    %17 = vector.multi_reduction <add>, %16, %cst_10 [1] : vector<8x128xf32> to vector<8xf32>
    %18 = vector.shape_cast %17 : vector<8xf32> to vector<8x1xf32>
    %c3 = arith.constant 3 : index
    %c0_11 = arith.constant 0 : index
    %19 = vector.load %arg4[%c3, %c0_11] : memref<4x128xf32, #tpu.memory_space<vmem>>, vector<1x1xf32>
    %20 = vector.broadcast %19 : vector<1x1xf32> to vector<8x1xf32>
    %21 = arith.addf %18, %20 : vector<8x1xf32>
    %c0_12 = arith.constant 0 : index
    %c0_13 = arith.constant 0 : index
    %22 = vector.load %arg5[%c0_12, %c0_13] : memref<8x1xf32, #tpu.memory_space<vmem>>, vector<8x1xf32>
    tpu.vector_store %arg5[%c0_12, %c0_13], %21 {strides = array<i32>} : memref<8x1xf32, #tpu.memory_space<vmem>>, vector<8x1xf32>,
    return
  }
  func.func @transform_0(%arg0: i32) -> (i32, i32) {
    %c0_i32 = arith.constant 0 : i32
    %c0_i32_0 = arith.constant 0 : i32
    return %arg0, %c0_i32 : i32, i32
  }
  func.func @transform_1(%arg0: i32) -> (i32, i32) {
    %c0_i32 = arith.constant 0 : i32
    %c0_i32_0 = arith.constant 0 : i32
    return %arg0, %c0_i32 : i32, i32
  }
  func.func @transform_2(%arg0: i32) -> (i32, i32) {
    %c0_i32 = arith.constant 0 : i32
    %c0_i32_0 = arith.constant 0 : i32
    %c0_i32_1 = arith.constant 0 : i32
    return %c0_i32, %c0_i32_0 : i32, i32
  }
  func.func @transform_3(%arg0: i32) -> (i32, i32) {
    %c0_i32 = arith.constant 0 : i32
    %c0_i32_0 = arith.constant 0 : i32
    %c0_i32_1 = arith.constant 0 : i32
    return %c0_i32, %c0_i32_0 : i32, i32
  }
  func.func @transform_4(%arg0: i32) -> (i32, i32) {
    %c0_i32 = arith.constant 0 : i32
    %c0_i32_0 = arith.constant 0 : i32
    return %arg0, %c0_i32 : i32, i32
  }
}

</mosaic_0001>

<bundles_post_ra>
// kernel: tpu_custom_call.1
= control target key start
LH: loop header
LB: loop body
LE: loop exit
PB: predicated region body
PF: predicated region fallthrough
CT: control target
= control target key end

     0   :  { %9 = vsyncpa [#allocation3], 0  ;;  %s211_s0 = inlined_call_operand.vmem [shape: f32[8,16], index: 0, kind: input, shape index: {}]   ;;  %s212_s1 = inlined_call_operand.vmem [shape: f32[8,1], index: 1, kind: input, shape index: {}]   ;;  %s213_s2 = inlined_call_operand.hbm [shape: f32[16,128], index: 2, kind: input, shape index: {}]   ;;  %s214_s3 = inlined_call_operand.hbm [shape: f32[4,128], index: 3, kind: input, shape index: {}]   ;;  %s215_s4 = inlined_call_operand.vmem [shape: f32[8,1], index: 4, kind: output, shape index: {}]  }
   0x1   :  { %s19_s17 = sshll.u32 %s213_s2, 4  ;;  %s20_s17 = int_to_ptr.hbm [resolvable:$true] %s19_s17 }
   0x2   :  { %10 = vsyncpa [#allocation5], 0  ;;  %s166_s18 = smov [#allocation2]   ;;  %s33_s22 = sshll.u32 %s214_s3, 4  ;;  %s34_s22 = int_to_ptr.hbm [resolvable:$true] %s33_s22 }
   0x3   :  { %s21_s19 = sshll.u32 %s166_s18, 4  ;;  %s167_s23 = smov 128   ;;  %s22_s19 = int_to_ptr.vmem [resolvable:$true] %s21_s19 }
   0x4   :  { %s168_s24 = smov 8   ;;  %s169_s25 = smov [#allocation4]  }
   0x5   :  { %27 = dma.hbm_to_vmem [thread:$0]  %s20_s17, 256, %s22_s19, [#allocation3], %s167_s23, %s167_s23, %s168_s24  }
   0x6   :  { %s35_s26 = sshll.u32 %s169_s25, 4  ;;  %s36_s26 = int_to_ptr.vmem [resolvable:$true] %s35_s26 }
   0x7   :  { %38 = dma.hbm_to_vmem [thread:$0]  %s34_s22, 64, %s36_s26, [#allocation5]  }
   0x8   :  { %162 = dma.done.wait [#allocation3], 256  }
   0x9   :  { %163 = vsyncadd [#allocation3], 4294967040 }
   0xa   :  { %164 = dma.done.wait [#allocation5], 64  }
   0xb   :  { %165 = vsyncadd [#allocation5], 4294967232  ;;  %v170_v0 = vmov 0   ;;  %v49_v1 = vld [vmem:[#allocation2 + $0x8] sm:$0xff]  ;;  %v48_v2 = vld [vmem:[#allocation2] sm:$0xff]  ;;  %vm59_vm0 = vcmask 130048  }
   0xc   :  { %109 = vset.pattern.permute.xlu0 %v170_v0  ;;  %77 = vmatpush.msra.mxu0 %v49_v1  ;;  %v47_v3 = vld [vmem:[%s211_s0] sm:$0xff]  ;;  %v110_v5 = vld [vmem:[#allocation4] ss:$0 sm:$0xff]  ;;  %v111_v8 = vld [vmem:[#allocation4 + $0x1] ss:$0 sm:$0xff]  ;;  %vm95_vm1 = vcmask 7168  }
   0xd   :  { %v50_v4 = vld [vmem:[%s212_s1] sm:$0xff]  ;;  %v112_v12 = vld [vmem:[#allocation4 + $0x2] ss:$0 sm:$0xff]  ;;  %v113_v15 = vld [vmem:[#allocation4 + $0x3] ss:$0 sm:$0xff] }
   0xe   :  { %54 = vperm.xlu0 %109, %v50_v4   ;;  %78 = vmatpush.msra.mxu0 %v48_v2 }
   0xf   :  { %103 = vmatmul.msk.f32.vlgmr.msra.gmra.mxu0 %vm59_vm0, %v47_v3 }
  0x80   :  { %v55_v6 = vpop.permute.xlu0 %54 }
  0x81   :  { %v58_v7 = vmul.f32 %v110_v5, %v55_v6 }
  0x8c   :  { %v80_v9 = vpop.f32.mrf.mxu0 }
  0x8d   :  { %v81_v10 = vadd.f32 %v80_v9, %v58_v7 }
  0x8f   :  { %v85_v11 = vadd.f32 %v111_v8, %v81_v10 }
  0x91   :  { %v86_v13 = vmax.f32 %v85_v11, 0.0 }
  0x93   :  { %v89_v14 = vmul.f32 %v112_v12, %v86_v13 }
  0x95   :  { %90 = vadd.xlane.f32.xlu0 %v89_v14 }
 0x108   :  { %v91_v16 = vpop.xlane.xlu0 %90 }
 0x109   :  { %v94_v17 = vadd.f32 %v113_v15, %v91_v16 }
 0x10b   :  { %96 = vst.msk [vmem:[%s215_s4] sm:$0xff] %vm95_vm1, %v94_v17 }
 0x10c   :  { %101 = vsyncpa [#allocation3], 1 }
 0x10d   :  { %102 = vsyncpa [#allocation5], 1 }

</bundles_post_ra>
